<compile_context>
chip_gen: v7x
topology: tpu7x:2x2x1
jax: 0.10.0
libtpu: 0.0.40
codegen_flags: <defaults>
</compile_context>

<pallas_src>
import jax
import jax.numpy as jnp
import numpy as np
from jax.experimental import pallas as pl
from jax.experimental.pallas import tpu as pltpu

_MB = 1024 * 1024


def _actnorm_kernel(x_ref, sb_ref, y_ref):
    # Pure VPU elementwise on lane-dense (tm, tk) tiles; per-row (tm, 1)
    # scale/bias broadcast across the lane axis.
    s = sb_ref[:, 0:1]
    b = sb_ref[:, 1:2]
    y_ref[...] = (s * (x_ref[...] + b)).astype(y_ref.dtype)


def _round_down_mult(x, m):
    return (x // m) * m


def _vmem_capacity_bytes():
    try:
        info = pltpu.get_tpu_info()
        cap = getattr(info, "vmem_capacity_bytes", None)
        if cap:
            return int(cap)
    except Exception:
        pass
    return 128 * _MB  # v5e / v6e default; also a safe assumption elsewhere


def _choose_tiles(M, K, itemsize):
    """Pick (block_rows, block_k) for a memory-bound elementwise kernel."""
    vmem_cap = _vmem_capacity_bytes()
    if vmem_cap <= 64 * _MB:
        target = 6 * _MB  # v7x: 64 MiB VMEM, ~3.2 TB/s HBM -> bigger tiles pay off
    else:
        target = 4 * _MB  # v5e / v6e: ~4 MiB is already ~roofline-saturating

    min_rows = 8 if M >= 8 else M

    # Start with full-width (lane-dense) blocks, rows sized to ~target bytes.
    block_k = K
    if M >= 8:
        rows = max(8, target // max(1, K * itemsize))
        block_rows = max(8, min(_round_down_mult(M, 8), _round_down_mult(rows, 8)))
    else:
        block_rows = M  # block equals full dim (< 8 rows)

    # If even a minimum-row full-width slab exceeds the target, tile the lanes
    # (128-multiple blocks; ragged lane edge is masked by Pallas).
    if block_rows * K * itemsize > target and K > 128:
        block_rows = min_rows
        kb = _round_down_mult(max(128, target // max(1, block_rows * itemsize)), 128)
        block_k = max(128, min(K, kb))

    def n_steps(br, bk):
        return (-(-M // br)) * (-(-K // bk))

    def halve_rows(br):
        if M < 8 or br <= 8:
            return br
        return max(8, _round_down_mult(br // 2, 8))

    def halve_k(bk):
        nk = _round_down_mult(bk // 2, 128)
        return bk if nk < 128 else nk

    # Prefer >= 4 grid steps (pipelining + both v7x TCs) while tiles stay >= ~1 MiB.
    while n_steps(block_rows, block_k) < 4:
        nr = halve_rows(block_rows)
        if nr < block_rows and nr * block_k * itemsize >= _MB:
            block_rows = nr
            continue
        nk = halve_k(block_k)
        if nk < block_k and block_rows * nk * itemsize >= _MB:
            block_k = nk
            continue
        break

    # Hard floor: never let the grid collapse to a single step (idle second TC
    # on v7x, zero DMA/compute overlap everywhere).
    while n_steps(block_rows, block_k) < 2:
        nr = halve_rows(block_rows)
        if nr < block_rows:
            block_rows = nr
            continue
        nk = halve_k(block_k)
        if nk < block_k:
            block_k = nk
            continue
        break  # tile already at the (8, 128)/full-dim minimum

    return block_rows, block_k


def actnorm_forward_pallas(x, s, b, *, block_rows=None, block_k=None):
    """y = s * (x + b) with per-channel s, b.  x: (N, C, H, W)."""
    N, C, H, W = x.shape
    K = H * W
    M = N * C
    itemsize = x.dtype.itemsize

    # Channels-major rows via a reshape-only view (no transpose, no copy).
    # NOTE: lane-dense stores require H*W % 128 == 0; otherwise edge stores are
    # masked (unavoidable without an extra padded copy, which costs more here).
    x_rows = x.reshape(M, K)

    # Fused per-row [s, b] columns (row = (n, c)); tiny (N*C*2 elements), one
    # small DMA per grid step instead of two.
    s_rows = jnp.broadcast_to(jnp.reshape(s, (1, C)), (N, C)).reshape(M, 1)
    b_rows = jnp.broadcast_to(jnp.reshape(b, (1, C)), (N, C)).reshape(M, 1)
    sb_rows = jnp.concatenate([s_rows, b_rows], axis=1).astype(x.dtype)  # (M, 2)

    auto_rows, auto_k = _choose_tiles(M, K, itemsize)
    if block_rows is None:
        block_rows = auto_rows
    if block_k is None:
        block_k = auto_k
    block_rows = int(block_rows)
    block_k = int(block_k)

    grid = (pl.cdiv(M, block_rows), pl.cdiv(K, block_k))
    block_bytes = block_rows * block_k * itemsize
    # Double-buffered in + out = ~4x the x tile, plus slack; always explicit so
    # v5e's 16 MiB default scoped limit never bites, capped well under v7x's
    # 64 MiB physical VMEM.
    vmem_limit = int(min(48 * _MB, max(32 * _MB, 4 * block_bytes + 4 * _MB)))

    # TODO(synk): consider input_output_aliases={0: 0} when the caller can
    # donate x (halves peak HBM footprint); left off here since the test reuses x.
    y_rows = pl.pallas_call(
        _actnorm_kernel,
        out_shape=jax.ShapeDtypeStruct((M, K), x.dtype),
        grid_spec=pltpu.PrefetchScalarGridSpec(
            num_scalar_prefetch=0,
            grid=grid,
            in_specs=[
                pl.BlockSpec((block_rows, block_k), lambda i, j: (i, j)),  # x tile
                pl.BlockSpec((block_rows, 2), lambda i, j: (i, 0)),        # [s, b]
            ],
            out_specs=pl.BlockSpec((block_rows, block_k), lambda i, j: (i, j)),
        ),
        compiler_params=pltpu.CompilerParams(
            dimension_semantics=("parallel", "parallel"),  # independent tiles
            vmem_limit_bytes=vmem_limit,
        ),
    )(x_rows, sb_rows)

    return y_rows.reshape(N, C, H, W)


class ActivationNormalization:
    """JAX/Pallas port of the PyTorch ActivationNormalization forward pass."""

    def __init__(self, in_channel, log_det=True):
        self.b = jnp.zeros((1, in_channel, 1, 1), jnp.float32)
        self.s = jnp.ones((1, in_channel, 1, 1), jnp.float32)
        self.log_det = log_det
        self.initialized = False

    def _initialize(self, x):
        # Data-dependent one-time parameter init (per-channel mean/std), done
        # in plain JAX exactly like the PyTorch __initialize().
        C = x.shape[1]
        flat = jnp.transpose(x, (1, 0, 2, 3)).reshape(C, -1)
        mean = jnp.mean(flat, axis=1)
        std = jnp.std(flat, axis=1, ddof=1)  # torch.std default: unbiased
        self.b = (-mean).reshape(1, C, 1, 1)
        self.s = (1.0 / (std + 1e-6)).reshape(1, C, 1, 1)

    def forward(self, x):
        h, w = x.shape[-2], x.shape[-1]
        if not self.initialized:
            self._initialize(x)
            self.initialized = True
        y = actnorm_forward_pallas(x, self.s, self.b)
        if self.log_det:
            # O(C) scalar reduction kept in the wrapper so the kernel grid
            # stays purely "parallel".
            logdet = h * w * jnp.sum(jnp.log(jnp.abs(self.s)))
            return y, logdet
        return y

    def reverse(self, y):
        return y / self.s - self.b


if __name__ == "__main__":
    key = jax.random.PRNGKey(0)
    N, C, H, W = 2, 4, 16, 16
    x = jax.random.normal(key, (N, C, H, W), dtype=jnp.float32)

    layer = ActivationNormalization(C, log_det=True)
    y, logdet = layer.forward(x)
    jax.block_until_ready((y, logdet))

    # Pure-JAX reference with identical semantics (incl. data-dependent init).
    flat = jnp.transpose(x, (1, 0, 2, 3)).reshape(C, -1)
    mean = jnp.mean(flat, axis=1)
    std = jnp.std(flat, axis=1, ddof=1)
    b_ref = (-mean).reshape(1, C, 1, 1)
    s_ref = (1.0 / (std + 1e-6)).reshape(1, C, 1, 1)
    y_ref = s_ref * (x + b_ref)
    logdet_ref = H * W * jnp.sum(jnp.log(jnp.abs(s_ref)))

    np.testing.assert_allclose(np.asarray(y), np.asarray(y_ref), rtol=1e-5, atol=1e-5)
    np.testing.assert_allclose(np.asarray(logdet), np.asarray(logdet_ref),
                               rtol=1e-5, atol=1e-5)

    # Exercise a ragged-M / lane-tiled configuration too (no padding path).
    N2, C2, H2, W2 = 3, 5, 16, 24   # M=15 (not a multiple of 8), K=384
    x2 = jax.random.normal(jax.random.PRNGKey(1), (N2, C2, H2, W2), jnp.float32)
    layer2 = ActivationNormalization(C2, log_det=False)
    y2 = layer2.forward(x2)
    jax.block_until_ready(y2)
    y2_ref = layer2.s * (x2 + layer2.b)
    np.testing.assert_allclose(np.asarray(y2), np.asarray(y2_ref), rtol=1e-5, atol=1e-5)

    print("KERNEL_OK")
</pallas_src>

<mosaic_0001>
module attributes {stable_mosaic.version = 11 : i64} {
  func.func @_actnorm_kernel(%arg0: i32, %arg1: i32, %arg2: memref<8x128xf32, #tpu.memory_space<vmem>>, %arg3: memref<8x2xf32, #tpu.memory_space<vmem>>, %arg4: memref<8x128xf32, #tpu.memory_space<vmem>>) attributes {dimension_semantics = [#tpu.dimension_semantics<parallel>, #tpu.dimension_semantics<parallel>], iteration_bounds = array<i64: 1, 2>, scalar_prefetch = 0 : i64, scratch_operands = 0 : i64, tpu.core_type = #tpu.core_type<tc>, window_params = [{transform_indices = @transform_0, window_bounds = array<i64: 8, 128>}, {transform_indices = @transform_1, window_bounds = array<i64: 8, 2>}, {transform_indices = @transform_2, window_bounds = array<i64: 8, 128>}]} {
    %c0 = arith.constant 0 : index
    %c0_0 = arith.constant 0 : index
    %0 = vector.load %arg3[%c0, %c0_0] : memref<8x2xf32, #tpu.memory_space<vmem>>, vector<8x1xf32>
    %c0_1 = arith.constant 0 : index
    %c1 = arith.constant 1 : index
    %1 = vector.load %arg3[%c0_1, %c1] : memref<8x2xf32, #tpu.memory_space<vmem>>, vector<8x1xf32>
    %c0_2 = arith.constant 0 : index
    %c0_3 = arith.constant 0 : index
    %2 = vector.load %arg2[%c0_2, %c0_3] : memref<8x128xf32, #tpu.memory_space<vmem>>, vector<8x128xf32>
    %3 = vector.broadcast %1 : vector<8x1xf32> to vector<8x128xf32>
    %4 = arith.addf %2, %3 : vector<8x128xf32>
    %5 = vector.broadcast %0 : vector<8x1xf32> to vector<8x128xf32>
    %6 = arith.mulf %5, %4 : vector<8x128xf32>
    %c0_4 = arith.constant 0 : index
    %c0_5 = arith.constant 0 : index
    %7 = vector.load %arg4[%c0_4, %c0_5] : memref<8x128xf32, #tpu.memory_space<vmem>>, vector<8x128xf32>
    tpu.vector_store %arg4[%c0_4, %c0_5], %6 {strides = array<i32>} : memref<8x128xf32, #tpu.memory_space<vmem>>, vector<8x128xf32>,
    return
  }
  func.func @transform_0(%arg0: i32, %arg1: i32) -> (i32, i32) {
    %c0_i32 = arith.constant 0 : i32
    return %arg0, %arg1 : i32, i32
  }
  func.func @transform_1(%arg0: i32, %arg1: i32) -> (i32, i32) {
    %c0_i32 = arith.constant 0 : i32
    %c0_i32_0 = arith.constant 0 : i32
    return %arg0, %c0_i32 : i32, i32
  }
  func.func @transform_2(%arg0: i32, %arg1: i32) -> (i32, i32) {
    %c0_i32 = arith.constant 0 : i32
    return %arg0, %arg1 : i32, i32
  }
}

</mosaic_0001>

<bundles_post_ra>
// kernel: tpu_custom_call.1
= control target key start
LH: loop header
LB: loop body
LE: loop exit
PB: predicated region body
PF: predicated region fallthrough
CT: control target
= control target key end

     0   :  { %7 = vsyncpa [#allocation3], 0  ;;  %s709_s0 = inlined_call_operand.hbm [shape: f32[8,256], index: 0, kind: input, shape index: {}]   ;;  %s710_s1 = inlined_call_operand.vmem [shape: f32[8,2], index: 1, kind: input, shape index: {}]   ;;  %s711_s2 = inlined_call_operand.hbm [shape: f32[8,256], index: 2, kind: output, shape index: {}]  }
   0x1   :  { %9 = vsyncpa [#allocation3 + $0x1], 0 }
   0x2   :  { %10 = vsyncpa [#allocation4], 0 }
   0x3   :  { %12 = vsyncpa [#allocation4 + $0x1], 0  ;;  %s534_s9 = smov 0   ;;  %s536_s10 = smov 0  }
   0x4   :  { %s538_s11 = smov 0   ;;  %s540_s12 = smov 0  }
   0x5   :  { %s542_s13 = smov 0   ;;  %s544_s14 = smov 0  }
   0x6 LB: > { %s321_s15 = sadd.s32 4294967295, %s513_s14   ;;  %s322_s16 = sadd.s32 4294967294, %s513_s14   ;;  %s513_s14 = sphi %s544_s14, %s18_s14   ;;  %s509_s13 = sphi %s542_s13, %s727_s13   ;;  %s505_s12 = sphi %s540_s12, %s726_s12   ;;  %s501_s11 = sphi %s538_s11, %s725_s11   ;;  %s497_s10 = sphi %s536_s10, %s724_s10   ;;  %s493_s9 = sphi %s534_s9, %s723_s9  }
   0x7   : > { %s27_s17 = sadd.s32 1, %s509_s13  ;;  %s39_s18 = sadd.s32 1, %s501_s11 }
   0x8   : > { %p28_p0 = scmp.ge.s32.totalorder %s27_s17, 2  ;;  %p46_p1 = scmp.ne.s32.totalorder %s501_s11, %s497_s10 }
   0x9   : > { %p47_p2 = scmp.eq.s32.totalorder %s513_s14, 0  ;;  %p52_p3 = scmp.ne.s32.totalorder %s497_s10, %s493_s9 }
   0xa   : > { %s729_s17 = smov (%p28_p0, %s27_s17), 0  ;;  %p53_p5 = scmp.eq.s32.totalorder %s321_s15, 0 }
   0xb   : > { %p575_p4 = por %p47_p2, %p46_p1  ;;  %s35_s20 = ssub.s32 %s509_s13, %s729_s17 }
   0xc   : > { %p104_p6 = scmp.eq.s32.totalorder %s321_s15, 1  ;;  %p37_p7 = scmp.eq.s32.totalorder %s35_s20, 0 }
   0xd   : > { %p581_p8 = por %p53_p5, %p52_p3  ;;  %p110_p10 = scmp.eq.s32.totalorder %s322_s16, 1 }
   0xe   : > { %p585_p9 = por %p104_p6, %p46_p1  ;;  %p347_p13 = scmp.lt.s32.totalorder %s513_s14, 2 }
   0xf   : > { %s590_s23 = scalar_select %p37_p7, %s501_s11, %s39_s18  }
  0x10   : > { %s715_s22 = scalar_select %p585_p9, 1, 0 }
  0x11   : > { %p592_p11 = por %p110_p10, %p52_p3  ;;  %s137_s25 = sand.u32 1, %s501_s11  }
  0x12   : > { %s326_s26 = sshll.u32 %s137_s25, 3  ;;  %s327_s27 = sshll.u32 %s509_s13, 7 }
  0x13   : > { %s716_s24 = scalar_select %p592_p11, 1, 0 }
  0x14   : > { %s603_s30 = scalar_lea.hbm %s709_s0, %s327_s27  ;;  %s141_s3 = scalar_lea.vmem [#allocation2], %s326_s26 }
  0x15   : > { %s150_s4 = sshll.u32 %s141_s3, 4  ;;  %p609_p0 = pnand %p347_p13, %p575_p4  ;;  %s605_s4 = int_to_ptr.vmem [resolvable:$true] %s150_s4 }
  0x16   : > { %s138_s6 = scalar_lea.sflag [#allocation3], %s137_s25  ;;  %s401_s7 = scalar_lea.hbm %s603_s30, 128 }
  0x17   : > { %p402_p3 = scmp.ne.s32.totalorder %s603_s30, %s401_s7  ;;  %p403_p5 = pneg %p609_p0 }
  0x18   : > { %s406_s16 = scalar_lea.hbm %s709_s0, 256  ;;  %p407_p4 = scmp.lt.u32.totalorder %s603_s30, %s709_s0 }
  0x19   : > { %p404_p6 = pnand %p403_p5, %p402_p3  ;;  %p408_p10 = scmp.lt.u32.totalorder %s406_s16, %s401_s7 }
  0x1a   : > { %p410_p12 = scmp.lt.u32.totalorder %s401_s7, %s603_s30 }
  0x1b   : > { %p405_p7 = pneg %p404_p6  ;;  %p409_p13 = por %p408_p10, %p407_p4 }
  0x1d   : > { %p411_p1 = por %p410_p12, %p409_p13 }
  0x1f   : > { %p412_p2 = pnand %p411_p1, %p405_p7 }
  0x21   : > { %415 = shalt.err (!%p412_p2)
}
  0x22   : > { %s416_s20 = scalar_lea.vmem %s605_s4, 128  ;;  %s515_s25 = smov [#allocation2]  }
  0x23   : > { %p417_p3 = scmp.ne.s32.totalorder %s605_s4, %s416_s20  ;;  %s421_s26 = sshll.u32 %s515_s25, 4  ;;  %s422_s26 = int_to_ptr.vmem [resolvable:$false] %s421_s26 }
  0x24   : > { %s423_s27 = scalar_lea.vmem %s422_s26, 256  ;;  %p424_p9 = scmp.lt.s32.totalorder %s605_s4, %s422_s26 }
  0x25   : > { %p419_p6 = pnand %p417_p3, %p403_p5  ;;  %p425_p4 = scmp.lt.s32.totalorder %s423_s27, %s416_s20 }
  0x27   : > { %p420_p11 = pneg %p419_p6  ;;  %p426_p10 = por %p425_p4, %p424_p9 }
  0x29   : > { %p427_p12 = pnand %p426_p10, %p420_p11 }
  0x2b   : > { %430 = shalt.err (!%p427_p12)
}
  0x2c   : > { %342 = dma.hbm_to_vmem [thread:$0]  (!%p609_p0), %s603_s30, 128, %s605_s4, %s138_s6  }
  0x2d   : > { %p718_p1 = scmp.lt.s32.totalorder %s513_s14, 3  ;;  %p719_p2 = scmp.ge.s32.totalorder %s513_s14, 1 }
  0x2f   : > { %p156_p5 = pnand %p719_p2, %p718_p1 }
  0x30   : > { %s645_s28 = sand.u32 (!%p156_p5), 1, %s497_s10  }
  0x31   : > { %159 = sbr.rel (%p156_p5) target bundleno = 208 (0xd0), region = 28  ;;  %s329_s29 = sshll.u32 (!%p156_p5), %s645_s28, 3 }
  0x32   : > { %s162_s3 = scalar_lea.sflag (!%p156_p5), [#allocation3], %s645_s28  ;;  %s165_s7 = scalar_lea.vmem (!%p156_p5), [#allocation2], %s329_s29 }
  0x38   : > { %484 = dma.done.wait (%p581_p8), %s162_s3, 128  }
  0x39   : > { %486 = vsyncadd (%p581_p8), %s162_s3, 4294967168  ;;  %v516_v0 = vmov 1   ;;  %v194_v1 = vld [vmem:[%s710_s1] sm:$0xff]  ;;  %v517_v2 = vmov 0   ;;  %s332_s5 = sshll.u32 %s505_s12, 7  ;;  %s189_s6 = scalar_lea.vmem [#allocation5], %s329_s29 }
  0x3a   : > { %399 = vset.pattern.permute.xlu0 %v516_v0  ;;  %v195_v4 = vld [vmem:[%s165_s7] sm:$0xff]  ;;  %s224_s8 = sshll.u32 %s189_s6, 4  ;;  %s660_s16 = scalar_lea.hbm %s711_s2, %s332_s5  ;;  %s662_s8 = int_to_ptr.vmem [resolvable:$true] %s224_s8 }
  0x3b   : > { %198 = vperm.xlu0 %399, %v194_v1   ;;  %s209_s18 = scalar_lea.sflag [#allocation4], %s645_s28  ;;  %s431_s19 = scalar_lea.vmem %s662_s8, 128 }
  0x3c   : > { %p432_p8 = scmp.ne.s32.totalorder %s662_s8, %s431_s19  ;;  %p720_p9 = scmp.ne.s32.totalorder %s715_s22, 0 }
  0x3d   : > { %s518_s12 = smov [#allocation5]  }
  0x3e   : > { %p433_p11 = pnand %p432_p8, %p720_p9  ;;  %s435_s20 = sshll.u32 %s518_s12, 4  ;;  %s436_s20 = int_to_ptr.vmem [resolvable:$false] %s435_s20 }
  0x3f   : > { %400 = vset.pattern.permute.xlu0 %v517_v2  ;;  %s437_s25 = scalar_lea.vmem %s436_s20, 256  ;;  %p438_p7 = scmp.lt.s32.totalorder %s662_s8, %s436_s20 }
  0x40   : > { %203 = vperm.xlu0 %400, %v194_v1   ;;  %p434_p0 = pneg %p433_p11  ;;  %p439_p13 = scmp.lt.s32.totalorder %s437_s25, %s431_s19 }
  0x42   : > { %p440_p3 = por %p439_p13, %p438_p7 }
  0x44   : > { %p441_p6 = pnand %p440_p3, %p434_p0 }
  0xba   : > { %v199_v3 = vpop.permute.xlu0 %198 }
  0xbb   : > { %v201_v5 = vadd.f32 %v199_v3, %v195_v4 }
  0xbf   : > { %v204_v6 = vpop.permute.xlu0 %203 }
  0xc0   : > { %v206_v7 = vmul.f32 %v204_v6, %v201_v5 }
  0xc2   : > { %207 = vst [vmem:[%s189_s6] sm:$0xff] %v206_v7 }
  0xc3   : > { %444 = shalt.err (!%p441_p6)
}
  0xc4   : > { %s445_s26 = scalar_lea.hbm %s660_s16, 128  ;;  %s449_s29 = scalar_lea.hbm %s711_s2, 256 }
  0xc5   : > { %p446_p4 = scmp.ne.s32.totalorder %s660_s16, %s445_s26  ;;  %p450_p1 = scmp.lt.u32.totalorder %s660_s16, %s711_s2 }
  0xc6   : > { %p451_p2 = scmp.lt.u32.totalorder %s449_s29, %s445_s26  ;;  %p453_p8 = scmp.lt.u32.totalorder %s445_s26, %s660_s16 }
  0xc7   : > { %p447_p10 = pnand %p446_p4, %p720_p9 }
  0xc8   : > { %p452_p5 = por %p451_p2, %p450_p1 }
  0xc9   : > { %p448_p12 = pneg %p447_p10 }
  0xca   : > { %p454_p11 = por %p453_p8, %p452_p5 }
  0xcc   : > { %p455_p0 = pnand %p454_p11, %p448_p12 }
  0xce   : > { %458 = shalt.err (!%p455_p0)
}
  0xcf   : > { %337 = dma.vmem_to_hbm [thread:$0]  (%p720_p9), %s662_s8, 128, %s660_s16, %s209_s18  }
  0xd0 PF: > { %s236_s30 = sand.u32 1, %s493_s9   ;;  %p721_p7 = scmp.ne.s32.totalorder %s716_s24, 0 }
  0xd1   : > { %p722_p13 = scmp.ge.s32.totalorder %s513_s14, 2  ;;  %s237_s4 = scalar_lea.sflag [#allocation4], %s236_s30 }
  0xd3   : > { %p344_p3 = pnand %p722_p13, %p721_p7 }
  0xd5   : > { %488 = dma.done.wait (!%p344_p3), %s237_s4, 128  }
  0xd6   : > { %490 = vsyncadd (!%p344_p3), %s237_s4, 4294967168  ;;  %s18_s14 = sadd.s32 1, %s513_s14   ;;  %s723_s9 = smov %s497_s10 }
  0xd7   : > { %p15_p6 = scmp.ge.s32.totalorder %s18_s14, 4   ;;  %s724_s10 = smov %s501_s11 }
  0xd8   : > { %s725_s11 = smov %s590_s23  ;;  %s726_s12 = smov %s509_s13 }
  0xd9   : > { %s727_s13 = smov %s729_s17  ;;  %17 = sbr.rel (!%p15_p6) target bundleno = 6 (0x6), region = 76 }
  0xe0   :  { %242 = vsyncpa [#allocation3], 1 }
  0xe1   :  { %244 = vsyncpa [#allocation3 + $0x1], 1 }
  0xe2   :  { %245 = vsyncpa [#allocation4], 1 }
  0xe3   :  { %247 = vsyncpa [#allocation4 + $0x1], 1 }

</bundles_post_ra>
